<compile_context>
chip_gen: v6e
topology: v6e:2x2x1
jax: 0.10.0
libtpu: 0.0.40
codegen_flags: <defaults>
</compile_context>

<pallas_src>
import functools

import jax
import jax.numpy as jnp
from jax.experimental import pallas as pl
from jax.experimental.pallas import tpu as pltpu


_LANE_CHOICES = (512, 256, 128)   # lane-dense last dims (large multiples of 128)
_FP_RESIDENT_LIMIT = 2 << 20      # keep fake_pred resident in VMEM only if <= 2 MiB


def _round_up(x, m):
    return ((x + m - 1) // m) * m


def _cdiv(a, b):
    return -(-a // b)


def _vmem_capacity_bytes():
    """Best-effort per-TensorCore VMEM capacity; conservative default = 64 MiB (v7x)."""
    try:
        info = pltpu.get_tpu_info()
        v = getattr(info, "vmem_capacity_bytes", None)
        if v:
            return int(v)
    except Exception:
        pass
    return 64 << 20


def _num_tensorcores():
    """2 only where a 'parallel' grid axis actually shards across TensorCores (v7x)."""
    try:
        kind = jax.devices()[0].device_kind.lower()
    except Exception:
        return 1
    return 2 if "v7" in kind else 1


def _image_view(x, lane):
    """(rows, lane) lane-dense view of a flattened tensor.

    Copy-free in the common case (element count a multiple of `lane` and at least
    8 rows).  Tiny inputs (< 8 rows) and non-multiple-of-128 counts get a small
    zero pad; padded |fake - real| terms are exactly 0.
    """
    n = int(x.size)
    flat = x.reshape(-1)
    rows = max(_cdiv(n, lane), 8)
    total = rows * lane
    if total != n:
        flat = jnp.pad(flat, (0, total - n))
    return flat.reshape(rows, lane), rows


def _pred_block(fake_pred):
    """fake_pred as a small resident (rows, 128) block padded with 1.0
    so padded elements contribute exactly 0 to (fp - 1)^2."""
    n = int(fake_pred.size)
    lane = 128
    rows = _round_up(max(_cdiv(n, lane), 8), 8)
    total = rows * lane
    flat = fake_pred.reshape(-1)
    if total != n:
        flat = jnp.pad(flat, (0, total - n), constant_values=1.0)
    return flat.reshape(rows, lane)


def _anime_gan_loss_kernel(fp_ref, fi_ref, ri_ref, out_ref, acc_ref, *,
                           n_pred, n_img, n_inner, num_splits, block_rows,
                           total_rows, lane, needs_mask):
    if num_splits > 1:
        c = pl.program_id(0)   # "parallel" split (one per TensorCore on v7x)
        j = pl.program_id(1)   # "arbitrary" reduction axis over image tiles
    else:
        c = None               # single-TensorCore chips: no leading split axis
        j = pl.program_id(0)

    @pl.when(j == 0)
    def _init():
        acc_ref[...] = jnp.zeros_like(acc_ref)

    # Hot loop: per-lane VPU work only (sub / abs / folded adds).  The single
    # cross-lane XLU reduce and the divides happen once in the epilogue.
    fi = fi_ref[...].astype(jnp.float32)
    ri = ri_ref[...].astype(jnp.float32)
    contrib = jnp.abs(fi - ri)

    if needs_mask:
        # Mask rows beyond the true row count: covers the ragged last block and
        # (on the 2-core split) the clamped overhang block on the second core.
        blk = j if c is None else c * n_inner + j           # logical (unclamped)
        row0 = blk * block_rows
        row_ids = row0 + jax.lax.broadcasted_iota(jnp.int32, contrib.shape, 0)
        contrib = jnp.where(row_ids < total_rows, contrib, jnp.float32(0.0))

    # Fold the tile into a vreg-sized (8, lane) partial sum: pure VPU vreg adds.
    acc_ref[...] += contrib.reshape(block_rows // 8, 8, lane).sum(axis=0)

    @pl.when(j == n_inner - 1)
    def _finalize():
        l1_term = jnp.float32(10.0 / n_img) * jnp.sum(acc_ref[...])
        out_ref[0, 0] = l1_term

        def _add_gan_term():
            fp = fp_ref[...].astype(jnp.float32)             # tiny resident block
            g_sum = jnp.sum((fp - jnp.float32(1.0)) ** 2)
            out_ref[0, 0] = l1_term + g_sum * jnp.float32(1.0 / n_pred)

        if c is None:
            _add_gan_term()
        else:
            pl.when(c == 0)(_add_gan_term)                   # skip on core 1


def anime_gan_loss(fake_pred, real_pred, fake_images, real_images):
    """JAX/Pallas equivalent of AnimeGANLoss.forward.  Returns an f32 scalar."""
    del real_pred  # unused in the PyTorch forward; kept for signature parity
    assert fake_images.shape == real_images.shape

    n_pred = int(fake_pred.size)   # true element counts (padding excluded)
    n_img = int(fake_images.size)

    # ---- images: lane-dense (rows, lane) view, copy-free in the common case ----
    lane = next((l for l in _LANE_CHOICES if n_img % l == 0), _LANE_CHOICES[0])
    fi2d, rows = _image_view(fake_images, lane)
    ri2d, _ = _image_view(real_images, lane)

    # ---- per-generation tiling ------------------------------------------------
    vmem_cap = _vmem_capacity_bytes()
    big_vmem = vmem_cap >= (100 << 20)                 # v5e / v6e: 128 MiB VMEM
    tile_elems = (4096 if big_vmem else 2048) * 512    # ~8 MiB / ~4 MiB f32 tiles
    block_rows = max(8, (min(tile_elems // lane, rows) // 8) * 8)
    n_blocks = _cdiv(rows, block_rows)

    num_splits = _num_tensorcores()
    if n_blocks < num_splits:
        num_splits = 1
    n_inner = _cdiv(n_blocks, num_splits)
    needs_mask = (rows % block_rows != 0) or (num_splits * n_inner != n_blocks)

    # ---- fake_pred: tiny resident block, padded with 1.0 -> (fp-1)^2 == 0 ------
    fp2d = _pred_block(fake_pred)
    gan_in_kernel = int(fp2d.nbytes) <= _FP_RESIDENT_LIMIT
    if not gan_in_kernel:
        # TODO(synk): a huge discriminator map would deserve its own streamed
        # grid axis; for that atypical case the GAN term is done in plain JAX.
        fp2d = jnp.ones((8, 128), jnp.float32)          # contributes exactly 0

    # ---- grid / specs -----------------------------------------------------------
    if num_splits == 1:
        grid = (n_inner,)
        dims = ("arbitrary",)
        img_map = lambda j: (j, 0)
        fp_map = lambda j: (0, 0)
        out_map = lambda j: (0, 0)
    else:
        grid = (num_splits, n_inner)
        dims = ("parallel", "arbitrary")
        # Cores may get unequal block counts: clamp the DMA block index; the
        # kernel masks the overhang block (its logical rows are >= `rows`).
        img_map = lambda c, j: (jnp.minimum(c * n_inner + j, n_blocks - 1), 0)
        fp_map = lambda c, j: (0, 0)
        out_map = lambda c, j: (c, 0)

    img_spec = pl.BlockSpec((block_rows, lane), img_map)     # default double-buffer
    fp_spec = pl.BlockSpec(fp2d.shape, fp_map)                # resident, DMA'd once
    out_spec = pl.BlockSpec((1, 1), out_map, memory_space=pltpu.MemorySpace.SMEM)

    itemsize = jnp.dtype(fake_images.dtype).itemsize
    tile_in_bytes = block_rows * lane * itemsize
    tile_f32_bytes = block_rows * lane * 4
    # 2 streams x 2 buffers + elementwise/mask temporaries + resident fake_pred.
    vmem_limit = (2 * 2 * tile_in_bytes + 6 * tile_f32_bytes
                  + 2 * int(fp2d.nbytes) + (2 << 20))
    vmem_cap_limit = (96 << 20) if big_vmem else (56 << 20)
    vmem_limit = int(min(max(vmem_limit, 16 << 20), vmem_cap_limit))

    cost = pl.CostEstimate(
        flops=4 * int(fi2d.size) + 3 * int(fp2d.size),
        transcendentals=0,
        bytes_accessed=int(fi2d.nbytes) + int(ri2d.nbytes) + int(fp2d.nbytes) + 8,
    )

    kernel = functools.partial(
        _anime_gan_loss_kernel,
        n_pred=n_pred, n_img=n_img, n_inner=n_inner, num_splits=num_splits,
        block_rows=block_rows, total_rows=rows, lane=lane, needs_mask=needs_mask)

    partials = pl.pallas_call(
        kernel,
        out_shape=jax.ShapeDtypeStruct((num_splits, 1), jnp.float32),
        grid=grid,
        in_specs=[fp_spec, img_spec, img_spec],
        out_specs=out_spec,
        scratch_shapes=[pltpu.VMEM((8, lane), jnp.float32)],
        compiler_params=pltpu.CompilerParams(
            dimension_semantics=dims, vmem_limit_bytes=vmem_limit),
        cost_estimate=cost,
    )(fp2d, fi2d, ri2d)

    # Combine the per-core partial losses outside the kernel (no cross-core race).
    loss = jnp.sum(partials)
    if not gan_in_kernel:
        loss = loss + jnp.mean((fake_pred.astype(jnp.float32) - 1.0) ** 2)
    return loss


def _reference(fake_pred, fake_images, real_images):
    g = jnp.mean((fake_pred.astype(jnp.float32) - 1.0) ** 2)
    l1 = jnp.mean(jnp.abs(fake_images.astype(jnp.float32)
                          - real_images.astype(jnp.float32)))
    return g + 10.0 * l1


if __name__ == "__main__":
    key = jax.random.PRNGKey(0)
    k1, k2, k3, k4 = jax.random.split(key, 4)

    # Small shapes consistent with the module: patch-discriminator scores and
    # RGB-ish images (NCHW).
    fake_pred = jax.random.normal(k1, (2, 1, 16, 16), dtype=jnp.float32)
    real_pred = jax.random.normal(k2, (2, 1, 16, 16), dtype=jnp.float32)
    fake_images = jax.random.normal(k3, (2, 3, 16, 16), dtype=jnp.float32)
    real_images = jax.random.normal(k4, (2, 3, 16, 16), dtype=jnp.float32)

    loss = anime_gan_loss(fake_pred, real_pred, fake_images, real_images)
    loss = jax.block_until_ready(loss)

    ref = _reference(fake_pred, fake_images, real_images)
    assert jnp.allclose(loss, ref, rtol=1e-5, atol=1e-5), (loss, ref)

    print("KERNEL_OK")
</pallas_src>

<mosaic_0001>
module attributes {stable_mosaic.version = 11 : i64} {
  func.func @_anime_gan_loss_kernel(%arg0: i32, %arg1: memref<8x128xf32, #tpu.memory_space<vmem>>, %arg2: memref<8x512xf32, #tpu.memory_space<vmem>>, %arg3: memref<8x512xf32, #tpu.memory_space<vmem>>, %arg4: memref<1x1xf32, #tpu.memory_space<smem>>, %arg5: memref<8x512xf32, #tpu.memory_space<vmem>>) attributes {dimension_semantics = [#tpu.dimension_semantics<arbitrary>], iteration_bounds = array<i64: 1>, scalar_prefetch = 0 : i64, scratch_operands = 1 : i64, tpu.core_type = #tpu.core_type<tc>, window_params = [{pipeline_mode = #tpu.pipeline_mode<synchronous>, transform_indices = @transform_0, window_bounds = array<i64: 8, 128>}, {transform_indices = @transform_1, window_bounds = array<i64: 8, 512>}, {transform_indices = @transform_2, window_bounds = array<i64: 8, 512>}, {transform_indices = @transform_3, window_bounds = array<i64: 1, 1>}]} {
    %c0_i32 = arith.constant 0 : i32
    %0 = arith.cmpi eq, %arg0, %c0_i32 : i32
    %1 = arith.extui %0 : i1 to i32
    %c0_i32_0 = arith.constant 0 : i32
    %2 = arith.cmpi ne, %1, %c0_i32_0 : i32
    scf.if %2 {
      %cst_10 = arith.constant 0.000000e+00 : f32
      %15 = vector.broadcast %cst_10 : f32 to vector<8x512xf32>
      %c0_11 = arith.constant 0 : index
      %c0_12 = arith.constant 0 : index
      %16 = vector.load %arg5[%c0_11, %c0_12] : memref<8x512xf32, #tpu.memory_space<vmem>>, vector<8x512xf32>
      tpu.vector_store %arg5[%c0_11, %c0_12], %15 {strides = array<i32>} : memref<8x512xf32, #tpu.memory_space<vmem>>, vector<8x512xf32>,
    } else {
    }
    %c0 = arith.constant 0 : index
    %c0_1 = arith.constant 0 : index
    %3 = vector.load %arg2[%c0, %c0_1] : memref<8x512xf32, #tpu.memory_space<vmem>>, vector<8x512xf32>
    %c0_2 = arith.constant 0 : index
    %c0_3 = arith.constant 0 : index
    %4 = vector.load %arg3[%c0_2, %c0_3] : memref<8x512xf32, #tpu.memory_space<vmem>>, vector<8x512xf32>
    %5 = arith.subf %3, %4 : vector<8x512xf32>
    %6 = math.absf %5 : vector<8x512xf32>
    %c0_4 = arith.constant 0 : index
    %c0_5 = arith.constant 0 : index
    %7 = vector.load %arg5[%c0_4, %c0_5] : memref<8x512xf32, #tpu.memory_space<vmem>>, vector<8x512xf32>
    %8 = vector.shape_cast %6 : vector<8x512xf32> to vector<1x8x512xf32>
    %cst = arith.constant dense<0.000000e+00> : vector<8x512xf32>
    %9 = vector.multi_reduction <add>, %8, %cst [0] : vector<1x8x512xf32> to vector<8x512xf32>
    %10 = arith.addf %7, %9 : vector<8x512xf32>
    %c0_6 = arith.constant 0 : index
    %c0_7 = arith.constant 0 : index
    %11 = vector.load %arg5[%c0_6, %c0_7] : memref<8x512xf32, #tpu.memory_space<vmem>>, vector<8x512xf32>
    tpu.vector_store %arg5[%c0_6, %c0_7], %10 {strides = array<i32>} : memref<8x512xf32, #tpu.memory_space<vmem>>, vector<8x512xf32>,
    %c0_i32_8 = arith.constant 0 : i32
    %12 = arith.cmpi eq, %arg0, %c0_i32_8 : i32
    %13 = arith.extui %12 : i1 to i32
    %c0_i32_9 = arith.constant 0 : i32
    %14 = arith.cmpi ne, %13, %c0_i32_9 : i32
    scf.if %14 {
      %c0_10 = arith.constant 0 : index
      %c0_11 = arith.constant 0 : index
      %15 = vector.load %arg5[%c0_10, %c0_11] : memref<8x512xf32, #tpu.memory_space<vmem>>, vector<8x512xf32>
      %16 = vector.shape_cast %15 : vector<8x512xf32> to vector<1x8x512xf32>
      %cst_12 = arith.constant dense<0.000000e+00> : vector<1xf32>
      %17 = vector.multi_reduction <add>, %16, %cst_12 [1, 2] : vector<1x8x512xf32> to vector<1xf32>
      %18 = vector.shape_cast %17 : vector<1xf32> to vector<1x1x1xf32>
      %19 = vector.extract %18[0, 0, 0] : f32 from vector<1x1x1xf32>
      %cst_13 = arith.constant 0.00651041651 : f32
      %20 = arith.mulf %cst_13, %19 : f32
      %c0_14 = arith.constant 0 : index
      %c0_15 = arith.constant 0 : index
      %21 = memref.load %arg4[%c0_14, %c0_15] : memref<1x1xf32, #tpu.memory_space<smem>>
      memref.store %20, %arg4[%c0_14, %c0_15] : memref<1x1xf32, #tpu.memory_space<smem>>
      %c0_16 = arith.constant 0 : index
      %c0_17 = arith.constant 0 : index
      %22 = vector.load %arg1[%c0_16, %c0_17] : memref<8x128xf32, #tpu.memory_space<vmem>>, vector<8x128xf32>
      %cst_18 = arith.constant 1.000000e+00 : f32
      %23 = vector.broadcast %cst_18 : f32 to vector<8x128xf32>
      %24 = arith.subf %22, %23 : vector<8x128xf32>
      %25 = arith.mulf %24, %24 : vector<8x128xf32>
      %26 = vector.shape_cast %25 : vector<8x128xf32> to vector<1x8x128xf32>
      %cst_19 = arith.constant dense<0.000000e+00> : vector<1xf32>
      %27 = vector.multi_reduction <add>, %26, %cst_19 [1, 2] : vector<1x8x128xf32> to vector<1xf32>
      %28 = vector.shape_cast %27 : vector<1xf32> to vector<1x1x1xf32>
      %29 = vector.extract %28[0, 0, 0] : f32 from vector<1x1x1xf32>
      %cst_20 = arith.constant 0.001953125 : f32
      %30 = arith.mulf %29, %cst_20 : f32
      %31 = arith.addf %20, %30 : f32
      %c0_21 = arith.constant 0 : index
      %c0_22 = arith.constant 0 : index
      %32 = memref.load %arg4[%c0_21, %c0_22] : memref<1x1xf32, #tpu.memory_space<smem>>
      memref.store %31, %arg4[%c0_21, %c0_22] : memref<1x1xf32, #tpu.memory_space<smem>>
    } else {
    }
    return
  }
  func.func @transform_0(%arg0: i32) -> (i32, i32) {
    %c0_i32 = arith.constant 0 : i32
    %c0_i32_0 = arith.constant 0 : i32
    %c0_i32_1 = arith.constant 0 : i32
    return %c0_i32, %c0_i32_0 : i32, i32
  }
  func.func @transform_1(%arg0: i32) -> (i32, i32) {
    %c0_i32 = arith.constant 0 : i32
    %c0_i32_0 = arith.constant 0 : i32
    return %arg0, %c0_i32 : i32, i32
  }
  func.func @transform_2(%arg0: i32) -> (i32, i32) {
    %c0_i32 = arith.constant 0 : i32
    %c0_i32_0 = arith.constant 0 : i32
    return %arg0, %c0_i32 : i32, i32
  }
  func.func @transform_3(%arg0: i32) -> (i32, i32) {
    %c0_i32 = arith.constant 0 : i32
    %c0_i32_0 = arith.constant 0 : i32
    %c0_i32_1 = arith.constant 0 : i32
    return %c0_i32, %c0_i32_0 : i32, i32
  }
}

</mosaic_0001>

<bundles_post_ra>
// kernel: tpu_custom_call.1
= control target key start
LH: loop header
LB: loop body
LE: loop exit
PB: predicated region body
PF: predicated region fallthrough
CT: control target
= control target key end

     0   :  { %8 = vsyncpa [#allocation4], 0  ;;  %s261_s0 = inlined_call_operand.hbm [shape: f32[8,128], index: 0, kind: input, shape index: {}]   ;;  %s262_s1 = inlined_call_operand.hbm [shape: f32[8,512], index: 1, kind: input, shape index: {}]   ;;  %s263_s2 = inlined_call_operand.hbm [shape: f32[8,512], index: 2, kind: input, shape index: {}]   ;;  %s264_s3 = inlined_call_operand.hbm [shape: f32[1,1], index: 3, kind: output, shape index: {}]  }
   0x1   :  { %9 = vsyncpa [#allocation7], 0 }
   0x2   :  { %10 = vsyncpa [#allocation5], 0  ;;  %s225_s12 = smov [#allocation6]   ;;  %s226_s14 = smov [#allocation3]  }
   0x3   :  { %s27_s13 = sshll.u32 %s225_s12, 4  ;;  %s17_s15 = sshll.u32 %s226_s14, 4  ;;  %s28_s13 = int_to_ptr.vmem [resolvable:$true] %s27_s13  ;;  %s18_s15 = int_to_ptr.vmem [resolvable:$true] %s17_s15 }
   0x4   :  { %s159_s16 = scalar_lea.vmem %s28_s13, 512  ;;  %p164_p1 = scmp.lt.s32.totalorder %s28_s13, %s28_s13 }
   0x5   :  { %p160_p0 = scmp.ne.s32.totalorder %s28_s13, %s159_s16  ;;  %p165_p2 = scmp.lt.s32.totalorder %s159_s16, %s159_s16 }
   0x7   :  { %p166_p3 = por %p165_p2, %p164_p1 }
   0x9   :  { %p167_p4 = pnand %p166_p3, %p160_p0 }
   0xb   :  { %170 = shalt.err (!%p167_p4)
}
   0xc   :  { %30 = dma.hbm_to_vmem [thread:$0]  %s262_s1, 512, %s28_s13, [#allocation7]  }
   0xd   :  { %s179_s19 = scalar_lea.vmem %s18_s15, 128  ;;  %p184_p6 = scmp.lt.s32.totalorder %s18_s15, %s18_s15 }
   0xe   :  { %p180_p5 = scmp.ne.s32.totalorder %s18_s15, %s179_s19  ;;  %p185_p7 = scmp.lt.s32.totalorder %s179_s19, %s179_s19 }
  0x10   :  { %p186_p8 = por %p185_p7, %p184_p6 }
  0x12   :  { %p187_p9 = pnand %p186_p8, %p180_p5 }
  0x14   :  { %190 = shalt.err (!%p187_p9)
}
  0x15   :  { %20 = dma.hbm_to_vmem [thread:$0]  %s261_s0, 128, %s18_s15, [#allocation4]  }
  0x16   :  { %s227_s22 = smov [#allocation8]  }
  0x17   :  { %s37_s23 = sshll.u32 %s227_s22, 4  ;;  %s38_s23 = int_to_ptr.vmem [resolvable:$true] %s37_s23 }
  0x18   :  { %s199_s24 = scalar_lea.vmem %s38_s23, 512  ;;  %p204_p11 = scmp.lt.s32.totalorder %s38_s23, %s38_s23 }
  0x19   :  { %p200_p10 = scmp.ne.s32.totalorder %s38_s23, %s199_s24  ;;  %p205_p12 = scmp.lt.s32.totalorder %s199_s24, %s199_s24 }
  0x1b   :  { %p206_p13 = por %p205_p12, %p204_p11 }
  0x1d   :  { %p207_p0 = pnand %p206_p13, %p200_p10 }
  0x1f   :  { %210 = shalt.err (!%p207_p0)
}
  0x20   :  { %40 = dma.hbm_to_vmem [thread:$0]  %s263_s2, 512, %s38_s23, [#allocation7]  }
  0x21   :  { %219 = dma.done.wait [#allocation4], 128  }
  0x22   :  { %220 = vsyncadd [#allocation4], 4294967168 }
  0x23   :  { %221 = dma.done.wait [#allocation7], 1024  }
  0x24   :  { %222 = vsyncadd [#allocation7], 4294966272  ;;  %v58_v0 = vld [vmem:[#allocation6] sm:$0xff]  ;;  %v59_v1 = vld [vmem:[#allocation6 + $0x8] sm:$0xff]  ;;  %s228_s29 = smov [#allocation9]  }
  0x25   :  { %v60_v2 = vld [vmem:[#allocation6 + $0x10] sm:$0xff]  ;;  %v61_v3 = vld [vmem:[#allocation6 + $0x18] sm:$0xff]  ;;  %v62_v4 = vld [vmem:[#allocation8] sm:$0xff] }
  0x26   :  { %v63_v5 = vld [vmem:[#allocation8 + $0x8] sm:$0xff]  ;;  %v64_v6 = vld [vmem:[#allocation8 + $0x10] sm:$0xff]  ;;  %v65_v7 = vld [vmem:[#allocation8 + $0x18] sm:$0xff]  ;;  %v66_v8 = vsub.f32 %v58_v0, %v62_v4 }
  0x27   :  { %v67_v9 = vsub.f32 %v59_v1, %v63_v5  ;;  %v68_v10 = vsub.f32 %v60_v2, %v64_v6  ;;  %v69_v11 = vsub.f32 %v61_v3, %v65_v7  ;;  %v112_v15 = vld [vmem:[#allocation3] sm:$0xff] }
  0x28   :  { %v70_v12 = vand.u32 2147483647, %v66_v8  ;;  %v142_v19 = vadd.f32 -1.0, %v112_v15 }
  0x29   :  { %v71_v13 = vand.u32 2147483647, %v67_v9  ;;  %v72_v14 = vand.u32 2147483647, %v68_v10  ;;  %v73_v16 = vand.u32 2147483647, %v69_v11 }
  0x2a   :  { %v114_v21 = vmul.f32 %v142_v19, %v142_v19 }
  0x2b   :  { %v97_v17 = vadd.f32 %v71_v13, %v70_v12 }
  0x2d   :  { %v98_v18 = vadd.f32 %v97_v17, %v72_v14 }
  0x2f   :  { %v99_v20 = vadd.f32 %v98_v18, %v73_v16 }
  0x31   :  { %100 = vadd.xlane.f32.xlu0 %v99_v20 }
  0x35   :  { %115 = vadd.xlane.f32.xlu0 %v114_v21 }
  0xba   :  { %v101_v22 = vpop.xlane.xlu0 %100 }
  0xbb   :  { %v102_v23 = vrot.slane %v101_v22, 4 }
  0xbd   :  { %v103_v24 = vadd.f32 %v102_v23, %v101_v22 }
  0xbe   :  { %v116_v25 = vpop.xlane.xlu0 %115 }
  0xbf   :  { %v104_v26 = vrot.slane %v103_v24, 2  ;;  %v117_v27 = vrot.slane %v116_v25, 4 }
  0xc1   :  { %v118_v28 = vadd.f32 %v117_v27, %v116_v25  ;;  %v105_v29 = vadd.f32 %v104_v26, %v103_v24 }
  0xc3   :  { %v119_v30 = vrot.slane %v118_v28, 2  ;;  %v106_v31 = vrot.slane %v105_v29, 1 }
  0xc5   :  { %v120_v32 = vadd.f32 %v119_v30, %v118_v28  ;;  %v107_v33 = vadd.f32 %v106_v31, %v105_v29 }
  0xc7   :  { %143 = vpush %v107_v33  ;;  %v121_v34 = vrot.slane %v120_v32, 1 }
  0xc9   :  { %v122_v35 = vadd.f32 %v121_v34, %v120_v32 }
  0xcb   :  { %145 = vpush %v122_v35 }
  0xf8   :  { %s144_s0 = spop %143 }
  0xf9   :  { %s109_s2 = smul.f32 0.0065104165, %s144_s0 }
  0xfc   :  { %s146_s26 = spop %145 }
  0xfd   :  { %s124_s27 = smul.f32 0.001953125, %s146_s26 }
  0xff   :  { %s125_s28 = sadd.f32 %s124_s27, %s109_s2 }
 0x101   :  { %126 = sst [smem:[#allocation9]] %s125_s28 }
 0x102   :  { %134 = dma.smem_to_hbm %s228_s29, 16, %s264_s3, [#allocation5]  }
 0x103   :  { %223 = dma.done.wait [#allocation5], 16  }
 0x104   :  { %224 = vsyncadd [#allocation5], 4294967280 }
 0x105   :  { %138 = sfence }
 0x106   :  { %139 = vsyncpa [#allocation4], 1 }
 0x107   :  { %140 = vsyncpa [#allocation7], 1 }
 0x108   :  { %141 = vsyncpa [#allocation5], 1 }

</bundles_post_ra>
